<compile_context>
chip_gen: v5e
topology: v5e:2x2
jax: 0.10.0
libtpu: 0.0.40
codegen_flags: <defaults>
</compile_context>

<pallas_src>
import jax
import jax.numpy as jnp
from jax.experimental import pallas as pl
from jax.experimental.pallas import tpu as pltpu


def _stable_softplus(x):
    # log1p(exp(x)) without overflow; matches jax.nn.softplus semantics.
    return jnp.maximum(x, 0.0) + jnp.log1p(jnp.exp(-jnp.abs(x)))


def make_resmlp_kernel(n_hidden, out_dim):
    """Kernel for a ResMLP with `n_hidden` hidden (tanh) layers.

    Transposed layout: every activation is (features, block_n).
    refs: x, [w_i, b_i] * n_hidden, w_head, b_head, post_bias, out
    """

    def kernel(*refs):
        x_ref = refs[0]
        idx = 1
        x = x_ref[...]                                     # (in_dim, block_n)
        h = x
        for _ in range(n_hidden):
            w_ref, b_ref = refs[idx], refs[idx + 1]
            idx += 2
            h = jnp.tanh(
                jnp.dot(w_ref[...], h, preferred_element_type=jnp.float32)
                + b_ref[...]                               # (d2, 1) lane-broadcast
            )
        w_head_ref, b_head_ref, pb_ref = refs[idx:idx + 3]
        out_ref = refs[idx + 3]

        # Fused Gaussian head + residual branch: one matmul on [h ; x].
        # (sublane concat at an 8-aligned boundary -> cheap)
        hx = jnp.concatenate([h, x], axis=0)               # (h_last+in_dim, block_n)
        g = jnp.dot(w_head_ref[...], hx,
                    preferred_element_type=jnp.float32) + b_head_ref[...]
        pb = pb_ref[...]                                   # (2*out_dim, 1): [0 ; softplus(b2)]

        if out_dim % 8 == 0:
            # Variance half is an exact sublane-tile slice: softplus only there.
            out_ref[:out_dim, :] = g[:out_dim, :].astype(out_ref.dtype)
            out_ref[out_dim:, :] = (
                _stable_softplus(g[out_dim:, :]) + pb[out_dim:, :]
            ).astype(out_ref.dtype)
        else:
            # Fallback for non-8-aligned out_dim: sublane mask select.
            row = jax.lax.broadcasted_iota(jnp.int32, g.shape, 0)
            out = jnp.where(row >= out_dim, _stable_softplus(g) + pb, g)
            out_ref[...] = out.astype(out_ref.dtype)

    return kernel


def _round_up(x, m):
    return ((x + m - 1) // m) * m


def _choose_block_n(n_rows, target=8192):
    # Lane-dense minimum of 128, cap at `target`, and keep >= 2 parallel grid
    # blocks when there are enough rows (v7x has 2 TensorCores per chip).
    half = _round_up(max(pl.cdiv(n_rows, 2), 1), 128)
    return max(128, min(target, half))


def resmlp_forward(x, params, block_n=None):
    """params (PyTorch-orientation weights):
         hidden : [(w (d2, d1), b (d2,)), ...]
         wg     : (2*out_dim, h_last)   bg : (2*out_dim,)   (GaussianLayer linear)
         wres   : (out_dim, in_dim)     b1 : (out_dim,)     b2 : (out_dim,)
    Returns (out_1, out_2) with shape x.shape[:-1] + (out_dim,).
    """
    input_shape = x.shape
    in_dim = input_shape[-1]
    out_dim = params["wres"].shape[0]
    hidden = params["hidden"]
    n_hidden = len(hidden)

    # ---- layout plumbing: put the row/batch axis on the lanes ----------------
    xf = x.reshape(-1, in_dim).T                           # (in_dim, N)
    n_rows = xf.shape[1]

    if block_n is None:
        block_n = _choose_block_n(n_rows)
    block_n = max(128, _round_up(block_n, 128))
    n_blocks = pl.cdiv(n_rows, block_n)
    n_pad = n_blocks * block_n
    if n_pad != n_rows:
        xf = jnp.pad(xf, ((0, 0), (0, n_pad - n_rows)))    # zero rows: harmless, sliced off

    # ---- fused head operands (grid-invariant, precomputed in the wrapper) ----
    wg, bg = params["wg"], params["bg"]
    wres, b1, b2 = params["wres"], params["b1"], params["b2"]
    f32 = jnp.float32
    w_head = jnp.concatenate(
        [jnp.concatenate([wg[:out_dim], wres], axis=1),
         jnp.concatenate([wg[out_dim:],
                          jnp.zeros((out_dim, in_dim), wres.dtype)], axis=1)],
        axis=0)                                            # (2*out_dim, h_last + in_dim)
    b_head = jnp.concatenate([bg[:out_dim] + b1, bg[out_dim:]]).reshape(2 * out_dim, 1)
    post_bias = jnp.concatenate(
        [jnp.zeros((out_dim,), f32),
         jax.nn.softplus(b2.astype(f32))]).reshape(2 * out_dim, 1)

    def full_spec(a):
        nd = a.ndim
        return pl.BlockSpec(a.shape, lambda i, _nd=nd: (0,) * _nd)

    flat_params = []
    in_specs = [pl.BlockSpec((in_dim, block_n), lambda i: (0, i))]
    for (w, b) in hidden:
        b2d = b.reshape(-1, 1)
        flat_params += [w, b2d]
        in_specs += [full_spec(w), full_spec(b2d)]
    for a in (w_head, b_head, post_bias):
        flat_params.append(a)
        in_specs.append(full_spec(a))

    out_specs = pl.BlockSpec((2 * out_dim, block_n), lambda i: (0, i))
    out_shape = jax.ShapeDtypeStruct((2 * out_dim, n_pad), x.dtype)

    # Advisory cost estimate: small, HBM/overhead-bound custom call.
    dims = [in_dim] + [w.shape[0] for (w, _) in hidden]
    mm = sum(d1 * d2 for d1, d2 in zip(dims[:-1], dims[1:]))
    mm += (dims[-1] + in_dim) * 2 * out_dim
    n_param_elems = sum(int(a.size) for a in flat_params)
    cost = pl.CostEstimate(
        flops=2 * n_pad * mm,
        transcendentals=n_pad * (sum(dims[1:]) + 2 * out_dim),
        bytes_accessed=4 * (n_pad * (in_dim + 2 * out_dim) + n_param_elems),
    )

    fused = pl.pallas_call(
        make_resmlp_kernel(n_hidden, out_dim),
        grid=(n_blocks,),
        in_specs=in_specs,
        out_specs=out_specs,
        out_shape=out_shape,
        compiler_params=pltpu.CompilerParams(
            dimension_semantics=("parallel",),
            vmem_limit_bytes=32 * 1024 * 1024,
        ),
        cost_estimate=cost,
    )(xf, *flat_params)

    new_shape = input_shape[:-1] + (out_dim,)
    out1 = fused[:out_dim, :n_rows].T.reshape(new_shape)
    out2 = fused[out_dim:, :n_rows].T.reshape(new_shape)
    return out1, out2


if __name__ == "__main__":
    input_dim, hidden_dims, output_dim = 16, [32, 32], 8
    std_init = 0.01

    key = jax.random.PRNGKey(0)
    keys = iter(jax.random.split(key, 32))

    dims = [input_dim] + hidden_dims
    hidden = []
    for d1, d2 in zip(dims[:-1], dims[1:]):
        w = std_init * jax.random.normal(next(keys), (d2, d1), jnp.float32)   # (out, in)
        b = std_init * jax.random.normal(next(keys), (d2,), jnp.float32)
        hidden.append((w, b))

    h_last = dims[-1]
    # GaussianLayer: Linear(h_last, 2*output_dim); chunk -> [mean | raw_var].
    wg = std_init * jax.random.normal(next(keys), (2 * output_dim, h_last), jnp.float32)
    bg = std_init * jax.random.normal(next(keys), (2 * output_dim,), jnp.float32)

    # TODO(synk): random_partial_isometry is not provided by the source module;
    # a deterministic small-Gaussian init of the same (out, in) shape is used.
    wres = std_init * jax.random.normal(next(keys), (output_dim, input_dim), jnp.float32)
    b1 = jnp.zeros((output_dim,), jnp.float32)
    b2 = jnp.zeros((output_dim,), jnp.float32)

    params = dict(hidden=hidden, wg=wg, bg=bg, wres=wres, b1=b1, b2=b2)

    def reference(xin):
        xf = xin.reshape(-1, input_dim)
        h = xf
        for w, b in hidden:
            h = jnp.tanh(h @ w.T + b)
        g = h @ wg.T + bg
        mean, raw2 = g[:, :output_dim], g[:, output_dim:]
        res = xf @ wres.T + b1
        r1 = (mean + res).reshape(xin.shape[:-1] + (output_dim,))
        r2 = (jax.nn.softplus(raw2) + jax.nn.softplus(b2)).reshape(
            xin.shape[:-1] + (output_dim,))
        return r1, r2

    # Small input, auto block (single 128-lane block; exercises padding 16 -> 128).
    x = jax.random.normal(next(keys), (2, 8, input_dim), jnp.float32)
    r1, r2 = reference(x)
    out1, out2 = resmlp_forward(x, params)
    jax.block_until_ready(out1)
    jax.block_until_ready(out2)
    assert out1.shape == r1.shape and out2.shape == r2.shape
    assert jnp.allclose(out1, r1, atol=1e-5), "out_1 mismatch (small/padded path)"
    assert jnp.allclose(out2, r2, atol=1e-5), "out_2 mismatch (small/padded path)"

    # Larger input with forced block_n=128 -> grid of 3 blocks + padding 320 -> 384.
    x2 = jax.random.normal(next(keys), (4, 80, input_dim), jnp.float32)
    r1b, r2b = reference(x2)
    out1b, out2b = resmlp_forward(x2, params, block_n=128)
    jax.block_until_ready(out1b)
    jax.block_until_ready(out2b)
    assert jnp.allclose(out1b, r1b, atol=1e-5), "out_1 mismatch (multi-block path)"
    assert jnp.allclose(out2b, r2b, atol=1e-5), "out_2 mismatch (multi-block path)"

    print("KERNEL_OK")
</pallas_src>

<mosaic_0001>
module attributes {stable_mosaic.version = 11 : i64} {
  func.func @kernel(%arg0: i32, %arg1: memref<16x128xf32, #tpu.memory_space<vmem>>, %arg2: memref<32x16xf32, #tpu.memory_space<vmem>>, %arg3: memref<32x1xf32, #tpu.memory_space<vmem>>, %arg4: memref<32x32xf32, #tpu.memory_space<vmem>>, %arg5: memref<32x1xf32, #tpu.memory_space<vmem>>, %arg6: memref<16x48xf32, #tpu.memory_space<vmem>>, %arg7: memref<16x1xf32, #tpu.memory_space<vmem>>, %arg8: memref<16x1xf32, #tpu.memory_space<vmem>>, %arg9: memref<16x128xf32, #tpu.memory_space<vmem>>) attributes {dimension_semantics = [#tpu.dimension_semantics<parallel>], iteration_bounds = array<i64: 1>, scalar_prefetch = 0 : i64, scratch_operands = 0 : i64, tpu.core_type = #tpu.core_type<tc>, window_params = [{transform_indices = @transform_0, window_bounds = array<i64: 16, 128>}, {pipeline_mode = #tpu.pipeline_mode<synchronous>, transform_indices = @transform_1, window_bounds = array<i64: 32, 16>}, {pipeline_mode = #tpu.pipeline_mode<synchronous>, transform_indices = @transform_2, window_bounds = array<i64: 32, 1>}, {pipeline_mode = #tpu.pipeline_mode<synchronous>, transform_indices = @transform_3, window_bounds = array<i64: 32, 32>}, {pipeline_mode = #tpu.pipeline_mode<synchronous>, transform_indices = @transform_4, window_bounds = array<i64: 32, 1>}, {pipeline_mode = #tpu.pipeline_mode<synchronous>, transform_indices = @transform_5, window_bounds = array<i64: 16, 48>}, {pipeline_mode = #tpu.pipeline_mode<synchronous>, transform_indices = @transform_6, window_bounds = array<i64: 16, 1>}, {pipeline_mode = #tpu.pipeline_mode<synchronous>, transform_indices = @transform_7, window_bounds = array<i64: 16, 1>}, {transform_indices = @transform_8, window_bounds = array<i64: 16, 128>}]} {
    %c0 = arith.constant 0 : index
    %c0_0 = arith.constant 0 : index
    %0 = vector.load %arg1[%c0, %c0_0] : memref<16x128xf32, #tpu.memory_space<vmem>>, vector<16x128xf32>
    %c0_1 = arith.constant 0 : index
    %c0_2 = arith.constant 0 : index
    %1 = vector.load %arg2[%c0_1, %c0_2] : memref<32x16xf32, #tpu.memory_space<vmem>>, vector<32x16xf32>
    %cst = arith.constant dense<0.000000e+00> : vector<32x128xf32>
    %2 = tpu.matmul %1, %0, %cst {dimension_numbers = #tpu.dot_dimension_numbers<[1], [0], [0], [1], [0, 0, 1, 1], [], []>} : vector<32x16xf32>, vector<16x128xf32>, vector<32x128xf32> -> vector<32x128xf32>
    %c0_3 = arith.constant 0 : index
    %c0_4 = arith.constant 0 : index
    %3 = vector.load %arg3[%c0_3, %c0_4] : memref<32x1xf32, #tpu.memory_space<vmem>>, vector<32x1xf32>
    %4 = vector.broadcast %3 : vector<32x1xf32> to vector<32x128xf32>
    %5 = arith.addf %2, %4 : vector<32x128xf32>
    %6 = math.tanh %5 : vector<32x128xf32>
    %c0_5 = arith.constant 0 : index
    %c0_6 = arith.constant 0 : index
    %7 = vector.load %arg4[%c0_5, %c0_6] : memref<32x32xf32, #tpu.memory_space<vmem>>, vector<32x32xf32>
    %cst_7 = arith.constant dense<0.000000e+00> : vector<32x128xf32>
    %8 = tpu.matmul %7, %6, %cst_7 {dimension_numbers = #tpu.dot_dimension_numbers<[1], [0], [0], [1], [0, 0, 1, 1], [], []>} : vector<32x32xf32>, vector<32x128xf32>, vector<32x128xf32> -> vector<32x128xf32>
    %c0_8 = arith.constant 0 : index
    %c0_9 = arith.constant 0 : index
    %9 = vector.load %arg5[%c0_8, %c0_9] : memref<32x1xf32, #tpu.memory_space<vmem>>, vector<32x1xf32>
    %10 = vector.broadcast %9 : vector<32x1xf32> to vector<32x128xf32>
    %11 = arith.addf %8, %10 : vector<32x128xf32>
    %12 = math.tanh %11 : vector<32x128xf32>
    %13 = tpu.concatenate %12, %0 in 0 : vector<32x128xf32>, vector<16x128xf32> -> vector<48x128xf32>
    %c0_10 = arith.constant 0 : index
    %c0_11 = arith.constant 0 : index
    %14 = vector.load %arg6[%c0_10, %c0_11] : memref<16x48xf32, #tpu.memory_space<vmem>>, vector<16x48xf32>
    %cst_12 = arith.constant dense<0.000000e+00> : vector<16x128xf32>
    %15 = tpu.matmul %14, %13, %cst_12 {dimension_numbers = #tpu.dot_dimension_numbers<[1], [0], [0], [1], [0, 0, 1, 1], [], []>} : vector<16x48xf32>, vector<48x128xf32>, vector<16x128xf32> -> vector<16x128xf32>
    %c0_13 = arith.constant 0 : index
    %c0_14 = arith.constant 0 : index
    %16 = vector.load %arg7[%c0_13, %c0_14] : memref<16x1xf32, #tpu.memory_space<vmem>>, vector<16x1xf32>
    %17 = vector.broadcast %16 : vector<16x1xf32> to vector<16x128xf32>
    %18 = arith.addf %15, %17 : vector<16x128xf32>
    %c0_15 = arith.constant 0 : index
    %c0_16 = arith.constant 0 : index
    %19 = vector.load %arg8[%c0_15, %c0_16] : memref<16x1xf32, #tpu.memory_space<vmem>>, vector<16x1xf32>
    %20 = vector.extract_strided_slice %18 {offsets = [0, 0], sizes = [8, 128], strides = [1, 1]} : vector<16x128xf32> to vector<8x128xf32>
    %c0_17 = arith.constant 0 : index
    %c0_18 = arith.constant 0 : index
    %21 = vector.load %arg9[%c0_17, %c0_18] : memref<16x128xf32, #tpu.memory_space<vmem>>, vector<8x128xf32>
    tpu.vector_store %arg9[%c0_17, %c0_18], %20 {strides = array<i32>} : memref<16x128xf32, #tpu.memory_space<vmem>>, vector<8x128xf32>,
    %22 = vector.extract_strided_slice %18 {offsets = [8, 0], sizes = [8, 128], strides = [1, 1]} : vector<16x128xf32> to vector<8x128xf32>
    %cst_19 = arith.constant 0.000000e+00 : f32
    %23 = vector.broadcast %cst_19 : f32 to vector<8x128xf32>
    %24 = arith.maximumf %22, %23 : vector<8x128xf32>
    %25 = math.absf %22 : vector<8x128xf32>
    %cst_20 = arith.constant 0.000000e+00 : f32
    %26 = vector.broadcast %cst_20 : f32 to vector<8x128xf32>
    %27 = arith.subf %26, %25 : vector<8x128xf32>
    %28 = math.exp %27 : vector<8x128xf32>
    %29 = math.log1p %28 : vector<8x128xf32>
    %30 = arith.addf %24, %29 : vector<8x128xf32>
    %31 = vector.extract_strided_slice %19 {offsets = [8, 0], sizes = [8, 1], strides = [1, 1]} : vector<16x1xf32> to vector<8x1xf32>
    %32 = vector.broadcast %31 : vector<8x1xf32> to vector<8x128xf32>
    %33 = arith.addf %30, %32 : vector<8x128xf32>
    %c8 = arith.constant 8 : index
    %c0_21 = arith.constant 0 : index
    %34 = vector.load %arg9[%c8, %c0_21] : memref<16x128xf32, #tpu.memory_space<vmem>>, vector<8x128xf32>
    tpu.vector_store %arg9[%c8, %c0_21], %33 {strides = array<i32>} : memref<16x128xf32, #tpu.memory_space<vmem>>, vector<8x128xf32>,
    return
  }
  func.func @transform_0(%arg0: i32) -> (i32, i32) {
    %c0_i32 = arith.constant 0 : i32
    %c0_i32_0 = arith.constant 0 : i32
    return %c0_i32, %arg0 : i32, i32
  }
  func.func @transform_1(%arg0: i32) -> (i32, i32) {
    %c0_i32 = arith.constant 0 : i32
    %c0_i32_0 = arith.constant 0 : i32
    %c0_i32_1 = arith.constant 0 : i32
    return %c0_i32, %c0_i32_0 : i32, i32
  }
  func.func @transform_2(%arg0: i32) -> (i32, i32) {
    %c0_i32 = arith.constant 0 : i32
    %c0_i32_0 = arith.constant 0 : i32
    %c0_i32_1 = arith.constant 0 : i32
    return %c0_i32, %c0_i32_0 : i32, i32
  }
  func.func @transform_3(%arg0: i32) -> (i32, i32) {
    %c0_i32 = arith.constant 0 : i32
    %c0_i32_0 = arith.constant 0 : i32
    %c0_i32_1 = arith.constant 0 : i32
    return %c0_i32, %c0_i32_0 : i32, i32
  }
  func.func @transform_4(%arg0: i32) -> (i32, i32) {
    %c0_i32 = arith.constant 0 : i32
    %c0_i32_0 = arith.constant 0 : i32
    %c0_i32_1 = arith.constant 0 : i32
    return %c0_i32, %c0_i32_0 : i32, i32
  }
  func.func @transform_5(%arg0: i32) -> (i32, i32) {
    %c0_i32 = arith.constant 0 : i32
    %c0_i32_0 = arith.constant 0 : i32
    %c0_i32_1 = arith.constant 0 : i32
    return %c0_i32, %c0_i32_0 : i32, i32
  }
  func.func @transform_6(%arg0: i32) -> (i32, i32) {
    %c0_i32 = arith.constant 0 : i32
    %c0_i32_0 = arith.constant 0 : i32
    %c0_i32_1 = arith.constant 0 : i32
    return %c0_i32, %c0_i32_0 : i32, i32
  }
  func.func @transform_7(%arg0: i32) -> (i32, i32) {
    %c0_i32 = arith.constant 0 : i32
    %c0_i32_0 = arith.constant 0 : i32
    %c0_i32_1 = arith.constant 0 : i32
    return %c0_i32, %c0_i32_0 : i32, i32
  }
  func.func @transform_8(%arg0: i32) -> (i32, i32) {
    %c0_i32 = arith.constant 0 : i32
    %c0_i32_0 = arith.constant 0 : i32
    return %c0_i32, %arg0 : i32, i32
  }
}

</mosaic_0001>

<bundles_post_ra>
// kernel: tpu_custom_call.1
= control target key start
LH: loop header
LB: loop body
LE: loop exit
PB: predicated region body
PF: predicated region fallthrough
CT: control target
= control target key end

     0   :  { %v335_v3 = vmov 0   ;;  %vm60_vm0 = vcmask 130048   ;;  %s460_s0 = inlined_call_operand.vmem [shape: f32[16,128], index: 0, kind: input, shape index: {}]   ;;  %s461_s1 = inlined_call_operand.vmem [shape: f32[32,16], index: 1, kind: input, shape index: {}]   ;;  %s462_s2 = inlined_call_operand.vmem [shape: f32[32,1], index: 2, kind: input, shape index: {}]   ;;  %s463_s3 = inlined_call_operand.vmem [shape: f32[32,32], index: 3, kind: input, shape index: {}]   ;;  %s464_s4 = inlined_call_operand.vmem [shape: f32[32,1], index: 4, kind: input, shape index: {}]   ;;  %s465_s5 = inlined_call_operand.vmem [shape: f32[16,48], index: 5, kind: input, shape index: {}]   ;;  %s466_s6 = inlined_call_operand.vmem [shape: f32[16,1], index: 6, kind: input, shape index: {}]   ;;  %s467_s7 = inlined_call_operand.vmem [shape: f32[16,1], index: 7, kind: input, shape index: {}]   ;;  %s468_s8 = inlined_call_operand.hbm [shape: f32[16,128], index: 8, kind: output, shape index: {}]  }
   0x1   :  { %v31_v0 = vld [vmem:[%s460_s0 + $0x8] sm:$0xff]  ;;  %v39_v1 = vld [vmem:[%s462_s2 + $0x18] sm:$0xff]  ;;  %286 = vset.pattern.permute.xlu0 %v335_v3  ;;  %v30_v4 = vld [vmem:[%s460_s0] sm:$0xff]  ;;  %287 = vset.pattern.permute.xlu1 %v335_v3 }
   0x2   :  { %v37_v2 = vld [vmem:[%s462_s2 + $0x8] sm:$0xff]  ;;  %87 = vmatpush.msra.mxu0 %v31_v0  ;;  %v32_v5 = vld [vmem:[%s461_s1] sm:$0xff]  ;;  %57 = vperm.xlu0 %286, %v39_v1   ;;  %v35_v6 = vld [vmem:[%s461_s1 + $0x18] sm:$0xff] }
   0x3   :  { %47 = vperm.xlu1 %287, %v37_v2   ;;  %276 = vmatpush.msra.mxu1 %v31_v0 }
   0x4   :  { %88 = vmatpush.msra.mxu0 %v30_v4 }
   0x5   :  { %266 = vmatmul.msk.f32.vlgmr.msra.gmra.mxu0 %vm60_vm0, %v32_v5 }
   0x6   :  { %13 = vsyncpa [#allocation3], 0  ;;  %288 = vset.pattern.permute.xlu2 %v335_v3  ;;  %211 = vmatpush.msra.mxu2 %v31_v0  ;;  %v38_v7 = vld [vmem:[%s462_s2 + $0x10] sm:$0xff]  ;;  %v36_v8 = vld [vmem:[%s462_s2] sm:$0xff]  ;;  %vm134_vm1 = vcmask 261120   ;;  %vm194_vm2 = vcmask 392192  }
   0x7   :  { %277 = vmatpush.msra.mxu1 %v30_v4  ;;  %v33_v9 = vld [vmem:[%s461_s1 + $0x8] sm:$0xff]  ;;  %v110_v11 = vld [vmem:[%s464_s4] sm:$0xff]  ;;  %v34_v12 = vld [vmem:[%s461_s1 + $0x10] sm:$0xff]  ;;  %s254_s24 = sshll.u32 %s468_s8, 4  ;;  %s337_s25 = smov 128   ;;  %s255_s24 = int_to_ptr.hbm [resolvable:$true] %s254_s24 }
   0x8   :  { %269 = vmatmul.msk.f32.vlgmr.msra.gmra.mxu1 %vm60_vm0, %v35_v6  ;;  %212 = vmatpush.msra.mxu2 %v30_v4  ;;  %v111_v10 = vld [vmem:[%s464_s4 + $0x8] sm:$0xff]  ;;  %v182_v13 = vld [vmem:[%s466_s6] sm:$0xff]  ;;  %v113_v22 = vld [vmem:[%s464_s4 + $0x18] sm:$0xff]  ;;  %s338_s26 = smov 8  }
   0x9   :  { %v224_v14 = vld [vmem:[%s467_s7 + $0x8] sm:$0xff]  ;;  %131 = vperm.xlu2 %288, %v113_v22   ;;  %v112_v29 = vld [vmem:[%s464_s4 + $0x10] sm:$0xff]  ;;  %v106_v32 = vld [vmem:[%s463_s3] sm:$0xff] }
   0xa   :  { %52 = vperm.xlu0 %286, %v38_v7   ;;  %v107_v33 = vld [vmem:[%s463_s3 + $0x8] sm:$0xff]  ;;  %v108_v36 = vld [vmem:[%s463_s3 + $0x10] sm:$0xff]  ;;  %v109_v37 = vld [vmem:[%s463_s3 + $0x18] sm:$0xff] }
   0xb   :  { %42 = vperm.xlu1 %287, %v36_v8   ;;  %v183_v35 = vld [vmem:[%s466_s6 + $0x8] sm:$0xff]  ;;  %v180_v53 = vld [vmem:[%s465_s5] sm:$0xff] }
   0xc   :  { %v181_v55 = vld [vmem:[%s465_s5 + $0x8] sm:$0xff]  ;;  %s336_s5 = smov [#allocation2]  }
   0xd   :  { %267 = vmatmul.msk.f32.gmra.mxu0 %vm60_vm0, %v33_v9  ;;  %s252_s21 = sshll.u32 %s336_s5, 4  ;;  %s253_s21 = int_to_ptr.vmem [resolvable:$true] %s252_s21 }
  0x11   :  { %126 = vperm.xlu2 %288, %v112_v29  }
  0x12   :  { %121 = vperm.xlu0 %286, %v111_v10  }
  0x13   :  { %116 = vperm.xlu1 %287, %v110_v11  }
  0x15   :  { %268 = vmatmul.msk.f32.gmra.mxu0 %vm60_vm0, %v34_v12 }
  0x19   :  { %191 = vperm.xlu2 %288, %v183_v35  }
  0x1a   :  { %186 = vperm.xlu0 %286, %v182_v13  }
  0x1b   :  { %243 = vperm.xlu1 %287, %v224_v14  }
  0x63   :  { %v132_v39 = vpop.permute.xlu2 %131 }
  0x6b   :  { %v127_v41 = vpop.permute.xlu2 %126 }
  0x73   :  { %v192_v59 = vpop.permute.xlu2 %191 }
  0x74   :  { %v58_v16 = vpop.permute.xlu0 %57 }
  0x75   :  { %v48_v19 = vpop.permute.xlu1 %47 }
  0x7c   :  { %v53_v23 = vpop.permute.xlu0 %52 }
  0x7d   :  { %v43_v27 = vpop.permute.xlu1 %42 }
  0x82   :  { %v90_v15 = vpop.f32.mrf.mxu0 }
  0x83   :  { %v91_v28 = vadd.f32 %v90_v15, %v43_v27 }
  0x84   :  { %v122_v45 = vpop.permute.xlu0 %121 }
  0x85   :  { %v99_v17 = vpop.f32.mrf.mxu1  ;;  %v117_v48 = vpop.permute.xlu1 %116 }
  0x86   :  { %v100_v18 = vadd.f32 %v99_v17, %v58_v16 }
  0x88   :  { %289 = vtanh.f32 %v100_v18 }
  0x8a   :  { %v93_v20 = vpop.f32.mrf.mxu0 }
  0x8b   :  { %v94_v25 = vadd.f32 %v93_v20, %v48_v19 }
  0x8c   :  { %v187_v56 = vpop.permute.xlu0 %186 }
  0x8d   :  { %v244_v12 = vpop.permute.xlu1 %243 }
  0x8e   :  { %v290_v21 = vpop.eup %289 }
  0x8f   :  { %159 = vmatpush.msrb.mxu1 %v290_v21  ;;  %278 = vmatpush.msra.mxu3 %v290_v21 }
  0x92   :  { %v96_v24 = vpop.f32.mrf.mxu0 }
  0x93   :  { %v97_v26 = vadd.f32 %v96_v24, %v53_v23 }
  0x95   :  { %291 = vtanh.f32 %v97_v26 }
  0x96   :  { %293 = vtanh.f32 %v94_v25 }
  0x97   :  { %295 = vtanh.f32 %v91_v28 }
  0x9b   :  { %v292_v30 = vpop.eup %291 }
  0x9c   :  { %160 = vmatpush.msrb.mxu1 %v292_v30  ;;  %279 = vmatpush.msra.mxu3 %v292_v30  ;;  %v294_v31 = vpop.eup %293 }
  0x9d   :  { %v296_v34 = vpop.eup %295 }
  0x9e   :  { %161 = vmatpush.msrb.mxu1 %v294_v31  ;;  %280 = vmatpush.msra.mxu3 %v294_v31 }
  0xa0   :  { %162 = vmatpush.msrb.mxu1 %v296_v34  ;;  %281 = vmatpush.msra.mxu3 %v296_v34 }
  0xa1   :  { %270 = vmatmul.msk.f32.vlgmr.msrb.gmra.mxu1 %vm134_vm1, %v106_v32  ;;  %271 = vmatmul.msk.f32.vlgmr.msra.gmra.mxu3 %vm134_vm1, %v107_v33 }
  0xa9   :  { %272 = vmatmul.msk.f32.gmra.mxu3 %vm134_vm1, %v108_v36 }
  0xb1   :  { %273 = vmatmul.msk.f32.gmra.mxu3 %vm134_vm1, %v109_v37 }
 0x11e   :  { %v164_v46 = vpop.f32.mrf.mxu1 }
 0x11f   :  { %v165_v49 = vadd.f32 %v164_v46, %v117_v48 }
 0x124   :  { %v167_v38 = vpop.f32.mrf.mxu3 }
 0x125   :  { %v168_v47 = vadd.f32 %v167_v38, %v122_v45 }
 0x12c   :  { %v170_v40 = vpop.f32.mrf.mxu3 }
 0x12d   :  { %v171_v43 = vadd.f32 %v170_v40, %v127_v41 }
 0x134   :  { %v173_v42 = vpop.f32.mrf.mxu3 }
 0x135   :  { %v174_v44 = vadd.f32 %v173_v42, %v132_v39 }
 0x137   :  { %297 = vtanh.f32 %v174_v44 }
 0x138   :  { %299 = vtanh.f32 %v171_v43 }
 0x139   :  { %301 = vtanh.f32 %v168_v47 }
 0x13a   :  { %303 = vtanh.f32 %v165_v49 }
 0x13d   :  { %v298_v50 = vpop.eup %297 }
 0x13e   :  { %213 = vmatpush.msra.mxu2 %v298_v50  ;;  %v300_v51 = vpop.eup %299 }
 0x13f   :  { %v302_v52 = vpop.eup %301 }
 0x140   :  { %214 = vmatpush.msra.mxu2 %v300_v51  ;;  %v304_v54 = vpop.eup %303 }
 0x142   :  { %215 = vmatpush.msra.mxu2 %v302_v52 }
 0x144   :  { %216 = vmatpush.msra.mxu2 %v304_v54 }
 0x145   :  { %274 = vmatmul.msk.f32.vlgmr.msra.gmra.mxu2 %vm194_vm2, %v180_v53 }
 0x14d   :  { %275 = vmatmul.msk.f32.gmra.mxu2 %vm194_vm2, %v181_v55 }
 0x1c8   :  { %v218_v57 = vpop.f32.mrf.mxu2 }
 0x1c9   :  { %v219_v58 = vadd.f32 %v218_v57, %v187_v56 }
 0x1cb   :  { %225 = vst [vmem:[#allocation2] sm:$0xff] %v219_v58 }
 0x1d0   :  { %v221_v60 = vpop.f32.mrf.mxu2 }
 0x1d1   :  { %v222_v61 = vadd.f32 %v221_v60, %v192_v59 }
 0x1d3   :  { %v227_v62 = vand.u32 2147483647, %v222_v61  ;;  %v226_v9 = vmax.f32 %v222_v61, 0.0 }
 0x1d5   :  { %v228_v63 = vsub.f32 0.0, %v227_v62 }
 0x1d7   :  { %v229_v0 = vmul.f32 1.442695, %v228_v63 }
 0x1d9   :  { %305 = vpow2.f32 %v229_v0 }
 0x1df   :  { %v306_v1 = vpop.eup %305 }
 0x1e0   :  { %v231_v2 = vadd.f32 1.0, %v306_v1  ;;  %v234_v3 = vmul.f32 -0.5, %v306_v1  ;;  %v237_v5 = vand.u32 2147483647, %v306_v1 }
 0x1e2   :  { %307 = vlog2.f32 %v231_v2  ;;  %v235_v4 = vadd.f32 1.0, %v234_v3  ;;  %vm238_vm3 = vcmp.lt.f32.partialorder %v237_v5, 0.0004427343 }
 0x1e4   :  { %v236_v8 = vmul.f32 %v306_v1, %v235_v4 }
 0x1e8   :  { %v308_v6 = vpop.eup %307 }
 0x1e9   :  { %v233_v7 = vmul.f32 0.6931472, %v308_v6 }
 0x1eb   :  { %v239_v10 = vsel %vm238_vm3, %v236_v8, %v233_v7 }
 0x1ec   :  { %v240_v11 = vadd.f32 %v239_v10, %v226_v9 }
 0x1ee   :  { %v246_v13 = vadd.f32 %v244_v12, %v240_v11 }
 0x1f0   :  { %247 = vst [vmem:[#allocation2 + $0x8] sm:$0xff] %v246_v13 }
 0x1f1   :  { %260 = dma.vmem_to_hbm [thread:$0]  %s253_s21, 256, %s255_s24, [#allocation3], %s337_s25, %s337_s25, %s338_s26  }
 0x1f2   :  { %333 = dma.done.wait [#allocation3], 256  }
 0x1f3   :  { %334 = vsyncadd [#allocation3], 4294967040 }
 0x1f4   :  { %265 = vsyncpa [#allocation3], 1 }

</bundles_post_ra>
